<compile_context>
chip_gen: v6e
topology: v6e:2x2x1
jax: 0.10.0
libtpu: 0.0.40
codegen_flags: <defaults>
</compile_context>

<pallas_src>
import functools

import jax
import jax.numpy as jnp
from jax import lax
from jax.experimental import pallas as pl
from jax.experimental.pallas import tpu as pltpu


def _round_up(x, m):
    return (x + m - 1) // m * m


# ----------------------------- Pallas kernel --------------------------------

def _stem_pool_head_kernel(p_ref, w_ref, b_ref, hwt_ref, hb_ref, o_ref, acc_ref,
                           *, hw_valid, t_hw, inv_hw, need_mask):
    """Fused stem-conv(+BN folded)+SiLU -> global-avg-pool -> Linear head.

    p_ref   : (1, Kpad, T_HW)  bf16   im2col patches (transposed, lane-dense)
    w_ref   : (OC, Kpad)       bf16   stem conv weights
    b_ref   : (OC, 1)          f32    stem conv bias (BN folded)
    hwt_ref : (OC, NC)         f32    classifier weight (transposed)
    hb_ref  : (1, NC)          f32    classifier bias
    o_ref   : (1, 1, NC)       f32    logits for this image
    acc_ref : (OC, 1)          f32    per-image channel-sum accumulator (scratch)
    """
    j = pl.program_id(1)

    @pl.when(j == 0)
    def _():
        acc_ref[...] = jnp.zeros_like(acc_ref)

    # Stem conv as matmul: (OC, Kpad) @ (Kpad, T_HW) -> (OC, T_HW), lane-dense.
    act = jnp.dot(w_ref[...], p_ref[0], preferred_element_type=jnp.float32)
    act = act + b_ref[...]                      # broadcast (OC, 1) over lanes
    act = act * jax.nn.sigmoid(act)             # SiLU (EUP)

    if need_mask:
        # Zero padded spatial columns so they do not pollute the pooled mean.
        col = lax.broadcasted_iota(jnp.int32, (1, t_hw), 1) + j * t_hw
        act = jnp.where(col < hw_valid, act, 0.0)

    # Accumulate per-channel spatial sums for the global average pool.
    acc_ref[...] += jnp.sum(act, axis=1, keepdims=True)      # (OC, 1)

    @pl.when(j == pl.num_programs(1) - 1)
    def _():
        pooled = acc_ref[...] * inv_hw                        # (OC, 1)
        # Head as broadcast-multiply + sublane reduce (avoids a tiny matmul):
        logits = jnp.sum(hwt_ref[...] * pooled, axis=0, keepdims=True) + hb_ref[...]
        o_ref[0] = logits                                     # (1, NC)


# ----------------------------- wrapper ---------------------------------------

def single_task_cnn_forward(x_nchw, params, *, t_hw_target=2048):
    """Forward pass. x_nchw: (N, 3, H, W) float32. Returns (N, num_classes)."""
    N, C, H, W = x_nchw.shape
    x_nhwc = jnp.transpose(x_nchw, (0, 2, 3, 1)).astype(jnp.float32)

    w_conv = params["conv_w"]          # (OC, C, KH, KW)  PyTorch layout
    b_conv = params["conv_b"]          # (OC,)
    oc, _, kh, kw = w_conv.shape
    stride, pad = 2, 1

    OH = (H + 2 * pad - kh) // stride + 1
    OW = (W + 2 * pad - kw) // stride + 1
    HW = OH * OW
    K = kh * kw * C

    # --- im2col, transposed so the large spatial axis sits on lanes ---------
    xp = jnp.pad(x_nhwc, ((0, 0), (pad, pad), (pad, pad), (0, 0)))
    cols = []
    for i in range(kh):
        for jj in range(kw):
            cols.append(xp[:, i:i + stride * OH:stride,
                            jj:jj + stride * OW:stride, :])    # (N, OH, OW, C)
    patches = jnp.stack(cols, axis=3).reshape(N, HW, K)         # k = (i*kw+jj)*C + c
    patches_t = jnp.transpose(patches, (0, 2, 1))               # (N, K, HW)

    # --- tiling: lane-aligned spatial tiles, balanced across the grid -------
    num_j = -(-HW // t_hw_target)                    # ceil
    T_HW = _round_up(-(-HW // num_j), 128)           # multiple of 128 lanes
    HW_pad = T_HW * num_j
    Kpad = _round_up(K, 8)

    patches_t = jnp.pad(
        patches_t, ((0, 0), (0, Kpad - K), (0, HW_pad - HW))
    ).astype(jnp.bfloat16)                                      # (N, Kpad, HW_pad)

    # Weights: (KH,KW,C,OC) flattened matches patch ordering; transpose to (OC, K).
    w_mat = jnp.transpose(w_conv, (2, 3, 1, 0)).reshape(K, oc)
    w_t = jnp.pad(w_mat.T, ((0, 0), (0, Kpad - K))).astype(jnp.bfloat16)  # (OC, Kpad)
    b_col = b_conv.reshape(oc, 1).astype(jnp.float32)

    head_w = params["head_w"]                                   # (NC, OC)
    head_b = params["head_b"]                                   # (NC,)
    nc = head_w.shape[0]
    head_wt = head_w.T.astype(jnp.float32)                      # (OC, NC)
    head_b2 = head_b.reshape(1, nc).astype(jnp.float32)

    kernel = functools.partial(
        _stem_pool_head_kernel,
        hw_valid=HW, t_hw=T_HW, inv_hw=1.0 / HW, need_mask=(HW_pad != HW))

    out = pl.pallas_call(
        kernel,
        out_shape=jax.ShapeDtypeStruct((N, 1, nc), jnp.float32),
        grid_spec=pltpu.PrefetchScalarGridSpec(
            num_scalar_prefetch=0,
            grid=(N, num_j),
            in_specs=[
                pl.BlockSpec((1, Kpad, T_HW), lambda n, j: (n, 0, j)),
                pl.BlockSpec((oc, Kpad), lambda n, j: (0, 0)),
                pl.BlockSpec((oc, 1), lambda n, j: (0, 0)),
                pl.BlockSpec((oc, nc), lambda n, j: (0, 0)),
                pl.BlockSpec((1, nc), lambda n, j: (0, 0)),
            ],
            out_specs=pl.BlockSpec((1, 1, nc), lambda n, j: (n, 0, 0)),
            scratch_shapes=[pltpu.VMEM((oc, 1), jnp.float32)],
        ),
        compiler_params=pltpu.CompilerParams(
            dimension_semantics=("parallel", "arbitrary"),
            vmem_limit_bytes=32 * 1024 * 1024,
        ),
    )(patches_t, w_t, b_col, head_wt, head_b2)

    return out.reshape(N, nc)


def init_params(key, in_ch=3, stem_ch=32, num_classes=2):
    k1, k2, k3, k4 = jax.random.split(key, 4)
    return {
        "conv_w": 0.1 * jax.random.normal(k1, (stem_ch, in_ch, 3, 3), jnp.float32),
        "conv_b": 0.01 * jax.random.normal(k2, (stem_ch,), jnp.float32),
        "head_w": 0.1 * jax.random.normal(k3, (num_classes, stem_ch), jnp.float32),
        "head_b": 0.01 * jax.random.normal(k4, (num_classes,), jnp.float32),
    }


# ----------------------------- main ------------------------------------------

if __name__ == "__main__":
    key = jax.random.PRNGKey(0)
    kx, kp = jax.random.split(key)

    # Small, module-consistent shapes: batch=2, RGB channels=3, spatial=16x16.
    x = jax.random.normal(kx, (2, 3, 16, 16), jnp.float32)
    params = init_params(kp)

    fwd = jax.jit(single_task_cnn_forward)
    logits = fwd(x, params)
    jax.block_until_ready(logits)

    # quick sanity vs. pure-JAX f32 reference
    def ref_forward(x_nchw, p):
        y = jax.lax.conv_general_dilated(
            x_nchw, p["conv_w"], window_strides=(2, 2), padding=((1, 1), (1, 1)),
            dimension_numbers=("NCHW", "OIHW", "NCHW"))
        y = y + p["conv_b"][None, :, None, None]
        y = y * jax.nn.sigmoid(y)
        pooled = jnp.mean(y, axis=(2, 3))
        return pooled @ p["head_w"].T + p["head_b"]

    ref = ref_forward(x, params)
    assert logits.shape == (2, 2)
    # bf16 inputs / f32 accumulation -> loose tolerance
    assert jnp.allclose(logits, ref, atol=3e-2, rtol=3e-2), (logits, ref)

    print("KERNEL_OK")
</pallas_src>

<mosaic_0001>
module attributes {stable_mosaic.version = 11 : i64} {
  func.func @_stem_pool_head_kernel(%arg0: i32, %arg1: i32, %arg2: memref<1x32x128xbf16, #tpu.memory_space<vmem>>, %arg3: memref<32x32xbf16, #tpu.memory_space<vmem>>, %arg4: memref<32x1xf32, #tpu.memory_space<vmem>>, %arg5: memref<32x2xf32, #tpu.memory_space<vmem>>, %arg6: memref<1x2xf32, #tpu.memory_space<vmem>>, %arg7: memref<1x1x2xf32, #tpu.memory_space<vmem>>, %arg8: memref<32x1xf32, #tpu.memory_space<vmem>>) attributes {dimension_semantics = [#tpu.dimension_semantics<parallel>, #tpu.dimension_semantics<arbitrary>], iteration_bounds = array<i64: 2, 1>, scalar_prefetch = 0 : i64, scratch_operands = 1 : i64, tpu.core_type = #tpu.core_type<tc>, window_params = [{transform_indices = @transform_0, window_bounds = array<i64: 1, 32, 128>}, {pipeline_mode = #tpu.pipeline_mode<synchronous>, transform_indices = @transform_1, window_bounds = array<i64: 32, 32>}, {pipeline_mode = #tpu.pipeline_mode<synchronous>, transform_indices = @transform_2, window_bounds = array<i64: 32, 1>}, {pipeline_mode = #tpu.pipeline_mode<synchronous>, transform_indices = @transform_3, window_bounds = array<i64: 32, 2>}, {pipeline_mode = #tpu.pipeline_mode<synchronous>, transform_indices = @transform_4, window_bounds = array<i64: 1, 2>}, {transform_indices = @transform_5, window_bounds = array<i64: 1, 1, 2>}]} {
    %c0_i32 = arith.constant 0 : i32
    %0 = arith.cmpi eq, %arg1, %c0_i32 : i32
    %1 = arith.extui %0 : i1 to i32
    %c0_i32_0 = arith.constant 0 : i32
    %2 = arith.cmpi ne, %1, %c0_i32_0 : i32
    scf.if %2 {
      %cst_16 = arith.constant 0.000000e+00 : f32
      %34 = vector.broadcast %cst_16 : f32 to vector<32x1xf32>
      %c0_17 = arith.constant 0 : index
      %c0_18 = arith.constant 0 : index
      %35 = vector.load %arg8[%c0_17, %c0_18] : memref<32x1xf32, #tpu.memory_space<vmem>>, vector<32x1xf32>
      tpu.vector_store %arg8[%c0_17, %c0_18], %34 {strides = array<i32>} : memref<32x1xf32, #tpu.memory_space<vmem>>, vector<32x1xf32>,
    } else {
    }
    %c0 = arith.constant 0 : index
    %c0_1 = arith.constant 0 : index
    %3 = vector.load %arg3[%c0, %c0_1] : memref<32x32xbf16, #tpu.memory_space<vmem>>, vector<32x32xbf16>
    %c0_2 = arith.constant 0 : index
    %c0_3 = arith.constant 0 : index
    %c0_4 = arith.constant 0 : index
    %4 = vector.load %arg2[%c0_2, %c0_3, %c0_4] : memref<1x32x128xbf16, #tpu.memory_space<vmem>>, vector<1x32x128xbf16>
    %5 = vector.shape_cast %4 : vector<1x32x128xbf16> to vector<32x128xbf16>
    %cst = arith.constant dense<0.000000e+00> : vector<32x128xf32>
    %6 = tpu.matmul %3, %5, %cst {dimension_numbers = #tpu.dot_dimension_numbers<[1], [0], [0], [1], [0, 0, 1, 1], [], []>} : vector<32x32xbf16>, vector<32x128xbf16>, vector<32x128xf32> -> vector<32x128xf32>
    %c0_5 = arith.constant 0 : index
    %c0_6 = arith.constant 0 : index
    %7 = vector.load %arg4[%c0_5, %c0_6] : memref<32x1xf32, #tpu.memory_space<vmem>>, vector<32x1xf32>
    %8 = vector.broadcast %7 : vector<32x1xf32> to vector<32x128xf32>
    %9 = arith.addf %6, %8 : vector<32x128xf32>
    %10 = arith.negf %9 : vector<32x128xf32>
    %11 = math.exp %10 : vector<32x128xf32>
    %cst_7 = arith.constant 1.000000e+00 : f32
    %12 = vector.broadcast %cst_7 : f32 to vector<32x128xf32>
    %13 = arith.addf %12, %11 : vector<32x128xf32>
    %14 = arith.divf %12, %13 : vector<32x128xf32>
    %15 = arith.mulf %9, %14 : vector<32x128xf32>
    %16 = tpu.iota {dimensions = array<i32: 1>} : vector<1x128xi32>
    %c128_i32 = arith.constant 128 : i32
    %17 = arith.muli %arg1, %c128_i32 : i32
    %18 = vector.broadcast %17 : i32 to vector<1x128xi32>
    %19 = arith.addi %16, %18 : vector<1x128xi32>
    %c64_i32 = arith.constant 64 : i32
    %20 = vector.broadcast %c64_i32 : i32 to vector<1x128xi32>
    %21 = arith.cmpi slt, %19, %20 : vector<1x128xi32>
    %cst_8 = arith.constant 0.000000e+00 : f32
    %22 = vector.shape_cast %21 : vector<1x128xi1> to vector<1x128xi1>
    %23 = vector.broadcast %22 : vector<1x128xi1> to vector<32x128xi1>
    %24 = vector.broadcast %cst_8 : f32 to vector<32x128xf32>
    %25 = arith.select %23, %15, %24 : vector<32x128xi1>, vector<32x128xf32>
    %c0_9 = arith.constant 0 : index
    %c0_10 = arith.constant 0 : index
    %26 = vector.load %arg8[%c0_9, %c0_10] : memref<32x1xf32, #tpu.memory_space<vmem>>, vector<32x1xf32>
    %cst_11 = arith.constant dense<0.000000e+00> : vector<32xf32>
    %27 = vector.multi_reduction <add>, %25, %cst_11 [1] : vector<32x128xf32> to vector<32xf32>
    %28 = vector.shape_cast %27 : vector<32xf32> to vector<32x1xf32>
    %29 = arith.addf %26, %28 : vector<32x1xf32>
    %c0_12 = arith.constant 0 : index
    %c0_13 = arith.constant 0 : index
    %30 = vector.load %arg8[%c0_12, %c0_13] : memref<32x1xf32, #tpu.memory_space<vmem>>, vector<32x1xf32>
    tpu.vector_store %arg8[%c0_12, %c0_13], %29 {strides = array<i32>} : memref<32x1xf32, #tpu.memory_space<vmem>>, vector<32x1xf32>,
    %c0_i32_14 = arith.constant 0 : i32
    %31 = arith.cmpi eq, %arg1, %c0_i32_14 : i32
    %32 = arith.extui %31 : i1 to i32
    %c0_i32_15 = arith.constant 0 : i32
    %33 = arith.cmpi ne, %32, %c0_i32_15 : i32
    scf.if %33 {
      %c0_16 = arith.constant 0 : index
      %c0_17 = arith.constant 0 : index
      %34 = vector.load %arg8[%c0_16, %c0_17] : memref<32x1xf32, #tpu.memory_space<vmem>>, vector<32x1xf32>
      %cst_18 = arith.constant 1.562500e-02 : f32
      %35 = vector.broadcast %cst_18 : f32 to vector<32x1xf32>
      %36 = arith.mulf %34, %35 : vector<32x1xf32>
      %c0_19 = arith.constant 0 : index
      %c0_20 = arith.constant 0 : index
      %37 = vector.load %arg5[%c0_19, %c0_20] : memref<32x2xf32, #tpu.memory_space<vmem>>, vector<32x2xf32>
      %38 = vector.broadcast %36 : vector<32x1xf32> to vector<32x2xf32>
      %39 = arith.mulf %37, %38 : vector<32x2xf32>
      %cst_21 = arith.constant dense<0.000000e+00> : vector<2xf32>
      %40 = vector.multi_reduction <add>, %39, %cst_21 [0] : vector<32x2xf32> to vector<2xf32>
      %41 = vector.shape_cast %40 : vector<2xf32> to vector<1x2xf32>
      %c0_22 = arith.constant 0 : index
      %c0_23 = arith.constant 0 : index
      %42 = vector.load %arg6[%c0_22, %c0_23] : memref<1x2xf32, #tpu.memory_space<vmem>>, vector<1x2xf32>
      %43 = arith.addf %41, %42 : vector<1x2xf32>
      %c0_24 = arith.constant 0 : index
      %c0_25 = arith.constant 0 : index
      %c0_26 = arith.constant 0 : index
      %44 = vector.load %arg7[%c0_24, %c0_25, %c0_26] : memref<1x1x2xf32, #tpu.memory_space<vmem>>, vector<1x1x2xf32>
      %45 = vector.shape_cast %44 : vector<1x1x2xf32> to vector<1x2xf32>
      %46 = vector.shape_cast %43 : vector<1x2xf32> to vector<1x1x2xf32>
      tpu.vector_store %arg7[%c0_24, %c0_25, %c0_26], %46 {strides = array<i32>} : memref<1x1x2xf32, #tpu.memory_space<vmem>>, vector<1x1x2xf32>,
    } else {
    }
    return
  }
  func.func @transform_0(%arg0: i32, %arg1: i32) -> (i32, i32, i32) {
    %c0_i32 = arith.constant 0 : i32
    %c0_i32_0 = arith.constant 0 : i32
    return %arg0, %c0_i32, %arg1 : i32, i32, i32
  }
  func.func @transform_1(%arg0: i32, %arg1: i32) -> (i32, i32) {
    %c0_i32 = arith.constant 0 : i32
    %c0_i32_0 = arith.constant 0 : i32
    %c0_i32_1 = arith.constant 0 : i32
    return %c0_i32, %c0_i32_0 : i32, i32
  }
  func.func @transform_2(%arg0: i32, %arg1: i32) -> (i32, i32) {
    %c0_i32 = arith.constant 0 : i32
    %c0_i32_0 = arith.constant 0 : i32
    %c0_i32_1 = arith.constant 0 : i32
    return %c0_i32, %c0_i32_0 : i32, i32
  }
  func.func @transform_3(%arg0: i32, %arg1: i32) -> (i32, i32) {
    %c0_i32 = arith.constant 0 : i32
    %c0_i32_0 = arith.constant 0 : i32
    %c0_i32_1 = arith.constant 0 : i32
    return %c0_i32, %c0_i32_0 : i32, i32
  }
  func.func @transform_4(%arg0: i32, %arg1: i32) -> (i32, i32) {
    %c0_i32 = arith.constant 0 : i32
    %c0_i32_0 = arith.constant 0 : i32
    %c0_i32_1 = arith.constant 0 : i32
    return %c0_i32, %c0_i32_0 : i32, i32
  }
  func.func @transform_5(%arg0: i32, %arg1: i32) -> (i32, i32, i32) {
    %c0_i32 = arith.constant 0 : i32
    %c0_i32_0 = arith.constant 0 : i32
    %c0_i32_1 = arith.constant 0 : i32
    return %arg0, %c0_i32, %c0_i32_0 : i32, i32, i32
  }
}

</mosaic_0001>

<bundles_post_ra>
// kernel: single_task_cnn_forward.1
= control target key start
LH: loop header
LB: loop body
LE: loop exit
PB: predicated region body
PF: predicated region fallthrough
CT: control target
= control target key end

     0   :  { %10 = vsyncpa [#allocation4], 0  ;;  %s930_s0 = inlined_call_operand.vmem [shape: bf16[2,32,128], index: 0, kind: input, shape index: {}]   ;;  %s931_s1 = inlined_call_operand.vmem [shape: bf16[32,32], index: 1, kind: input, shape index: {}]   ;;  %s932_s2 = inlined_call_operand.vmem [shape: f32[32,1], index: 2, kind: input, shape index: {}]   ;;  %s933_s3 = inlined_call_operand.vmem [shape: f32[32,2], index: 3, kind: input, shape index: {}]   ;;  %s934_s4 = inlined_call_operand.vmem [shape: f32[1,2], index: 4, kind: input, shape index: {}]   ;;  %s935_s5 = inlined_call_operand.hbm [shape: f32[2,1,2], index: 5, kind: output, shape index: {}]  }
   0x1   :  { %12 = vsyncpa [#allocation4 + $0x1], 0  ;;  %s788_s18 = smov 0   ;;  %s790_s19 = smov 0  }
   0x2   :  { %s792_s20 = smov 0   ;;  %s794_s21 = smov 0  }
   0x3   :  { %s796_s22 = smov 0   ;;  %s798_s23 = smov 0  }
   0x4 LB: > { %s565_s24 = sadd.s32 4294967295, %s753_s23   ;;  %s566_s25 = sadd.s32 4294967294, %s753_s23   ;;  %s753_s23 = sphi %s798_s23, %s18_s23   ;;  %s749_s22 = sphi %s796_s22, %s942_s22   ;;  %s745_s21 = sphi %s794_s21, %s941_s21   ;;  %s741_s20 = sphi %s792_s20, %s940_s20   ;;  %s737_s19 = sphi %s790_s19, %s939_s19   ;;  %s733_s18 = sphi %s788_s18, %s938_s18  }
   0x5   : > { %s30_s26 = sadd.s32 1, %s749_s22  ;;  %s149_s27 = sadd.s32 1, %s741_s20 }
   0x6   : > { %p32_p0 = scmp.ge.s32.totalorder %s30_s26, 2  ;;  %p159_p1 = scmp.ne.s32.totalorder %s741_s20, %s737_s19 }
   0x7   : > { %p160_p2 = scmp.eq.s32.totalorder %s565_s24, 1  ;;  %p165_p3 = scmp.ne.s32.totalorder %s737_s19, %s733_s18 }
   0x8   : > { %s944_s26 = smov (%p32_p0, %s30_s26), 0  ;;  %p166_p5 = scmp.eq.s32.totalorder %s566_s25, 1 }
   0x9   : > { %p828_p4 = por %p160_p2, %p159_p1  ;;  %s146_s29 = ssub.s32 %s749_s22, %s944_s26 }
   0xa   : > { %p569_p6 = scmp.ge.s32.totalorder %s753_s23, 1  ;;  %p147_p7 = scmp.eq.s32.totalorder %s146_s29, 0 }
   0xb   : > { %p835_p8 = por %p166_p5, %p165_p3  ;;  %p207_p9 = scmp.lt.s32.totalorder %s753_s23, 3 }
   0xc   : > { %s841_s6 = scalar_select %p147_p7, %s741_s20, %s149_s27  }
   0xd   : > { %p208_p10 = pnand %p569_p6, %p207_p9 }
   0xe   : > { %p237_p11 = scmp.lt.s32.totalorder (!%p208_p10), %s745_s21, 1  ;;  %s582_s27 = sshll.u32 (!%p208_p10), %s745_s21, 4 }
   0xf   : > { %211 = sbr.rel (%p208_p10) target bundleno = 579 (0x243), region = 40  ;;  %s494_s10 = scalar_lea.hbm (!%p208_p10), %s935_s5, %s582_s27 }
  0x10   : > { %s757_s13 = smov (!%p208_p10), [#allocation3]  }
  0x14   : > { %v659_v0 = vld [vmem:[%s931_s1] sm:$0xff]   ;;  %vm309_vm0 = vcmask 261120   ;;  %s238_s9 = scalar_select %p237_p11, %s745_s21, 1  ;;  %v265_v2 = vld [vmem:[%s932_s2 + $0x10] sm:$0xff]  ;;  %v755_v3 = vmov 0   ;;  %v264_v4 = vld [vmem:[%s932_s2 + $0x8] sm:$0xff]  ;;  %v393_v34 = vlaneseq }
  0x15   : > { %594 = vmatprep.mubr.msk.bf16.mxu0 %vm309_vm0, %v659_v0  ;;  %v263_v1 = vld [vmem:[%s932_s2] sm:$0xff]  ;;  %655 = vset.pattern.permute.xlu0 %v755_v3  ;;  %v266_v5 = vld [vmem:[%s932_s2 + $0x18] sm:$0xff]  ;;  %v660_v8 = vld [vmem:[%s931_s1 + $0x8] sm:$0xff]   ;;  %vm250_vm1 = vcmask 7168   ;;  %v756_v9 = vmov 0.0   ;;  %vm465_vm3 = vcmask 15360  }
  0x16   : > { %656 = vset.pattern.permute.xlu1 %v755_v3  ;;  %s585_s14 = sshll.u32 %s238_s9, 4  ;;  %269 = vperm.xlu0 %655, %v263_v1   ;;  %251 = vst.msk [vmem:[#allocation2] sm:$0xff] %vm250_vm1, %v756_v9  ;;  %252 = vst.msk [vmem:[#allocation2 + $0x8] sm:$0xff] %vm250_vm1, %v756_v9  ;;  %v394_v35 = vand.u32 127, %v393_v34  ;;  %vm481_vm4 = vcmask 8192  }
  0x17   : > { %279 = vperm.xlu1 %656, %v265_v2   ;;  %s244_s17 = scalar_lea.vmem %s930_s0, %s585_s14  ;;  %253 = vst.msk [vmem:[#allocation2 + $0x10] sm:$0xff] %vm250_vm1, %v756_v9  ;;  %254 = vst.msk [vmem:[#allocation2 + $0x18] sm:$0xff] %vm250_vm1, %v756_v9  ;;  %s681_s14 = sshll.u32 %s757_s13, 4  ;;  %s682_s14 = int_to_ptr.vmem [resolvable:$false] %s681_s14 }
  0x18   : > { %v657_v6 = vld [vmem:[%s244_s17 + $0x8] sm:$0xff]   ;;  %v658_v7 = vld [vmem:[%s244_s17] sm:$0xff]   ;;  %vm398_vm2 = vcmp.lt.s32.totalorder %v394_v35, 64  ;;  %s235_s17 = sand.u32 1, %s737_s19   ;;  %s683_s21 = scalar_lea.vmem %s682_s14, 32 }
  0x19   : > { %590 = vmatprep.subr.bf16.mxu0 %v657_v6  ;;  %s236_s29 = scalar_lea.vmem [#allocation3], %s235_s17  ;;  %s484_s11 = scalar_lea.sflag [#allocation4], %s235_s17 }
  0x1a   : > { %274 = vperm.xlu0 %655, %v264_v4   ;;  %591 = vmatpush3.bf16.msra.mxu0 %v657_v6  ;;  %v437_v4 = vld [vmem:[%s933_s3] sm:$0xff]  ;;  %v439_v6 = vld [vmem:[%s933_s3 + $0x10] sm:$0xff]  ;;  %s496_s7 = sshll.u32 %s236_s29, 4  ;;  %s497_s7 = int_to_ptr.vmem [resolvable:$true] %s496_s7 }
  0x1b   : > { %284 = vperm.xlu1 %656, %v266_v5   ;;  %592 = vmatprep.subr.bf16.mxu0 %v658_v7  ;;  %s677_s12 = scalar_lea.vmem %s497_s7, 16  ;;  %p684_p1 = scmp.lt.s32.totalorder %s497_s7, %s682_s14 }
  0x1c   : > { %p678_p12 = scmp.ne.s32.totalorder %s497_s7, %s677_s12  ;;  %p685_p2 = scmp.lt.s32.totalorder %s683_s21, %s677_s12 }
  0x1d   : > { %v405_v48 = vld [vmem:[#allocation2] sm:$0xff]  ;;  %v406_v51 = vld [vmem:[#allocation2 + $0x8] sm:$0xff] }
  0x1e   : > { %593 = vmatpush3.bf16.msra.mxu0 %v658_v7  ;;  %v407_v52 = vld [vmem:[#allocation2 + $0x10] sm:$0xff]  ;;  %v408_v57 = vld [vmem:[#allocation2 + $0x18] sm:$0xff]  ;;  %v438_v7 = vld [vmem:[%s933_s3 + $0x8] sm:$0xff]  ;;  %p679_p13 = pnand %p678_p12, %p828_p4  ;;  %p686_p3 = por %p685_p2, %p684_p1 }
  0x20   : > { %p680_p0 = pneg %p679_p13 }
  0x21   : > { %595 = vmatmul.mubr.msk.bf16.vlgmr.msra.gmra.mxu0 %vm309_vm0, %v660_v8 }
  0x22   : > { %p687_p5 = pnand %p686_p3, %p680_p0 }
  0x91   : > { %v270_v11 = vpop.permute.xlu0 %269 }
  0x92   : > { %v280_v10 = vpop.permute.xlu1 %279 }
  0x95   : > { %v275_v21 = vpop.permute.xlu0 %274 }
  0x96   : > { %v285_v15 = vpop.permute.xlu1 %284 }
  0xe1   : > { %v596_v12 = vpop.f32.mrf.mxu0 }
  0xe2   : > { %v359_v13 = vadd.f32 %v596_v12, %v280_v10 }
  0xe3   : > { %v350_v14 = vpop.f32.mrf.mxu0 }
  0xe4   : > { %v580_v16 = vmul.f32 -1.442695, %v359_v13  ;;  %v351_v17 = vadd.f32 %v350_v14, %v270_v11 }
  0xe5   : > { %v597_v18 = vpop.f32.mrf.mxu0 }
  0xe6   : > { %661 = vpow2.f32 %v580_v16  ;;  %v578_v19 = vmul.f32 -1.442695, %v351_v17  ;;  %v362_v20 = vadd.f32 %v597_v18, %v285_v15 }
  0xe7   : > { %v353_v22 = vpop.f32.mrf.mxu0 }
  0xe8   : > { %663 = vpow2.f32 %v578_v19  ;;  %v581_v23 = vmul.f32 -1.442695, %v362_v20  ;;  %v354_v24 = vadd.f32 %v353_v22, %v275_v21 }
  0xea   : > { %665 = vpow2.f32 %v581_v23  ;;  %v579_v25 = vmul.f32 -1.442695, %v354_v24 }
  0xec   : > { %667 = vpow2.f32 %v579_v25 }
  0xf3   : > { %v662_v26 = vpop.eup %661 }
  0xf4   : > { %v379_v27 = vadd.f32 1.0, %v662_v26 }
  0xf5   : > { %v664_v28 = vpop.eup %663 }
  0xf6   : > { %v377_v29 = vadd.f32 1.0, %v664_v28  ;;  %669 = vrcp.f32 %v379_v27  ;;  %v479_v28 = vld [vmem:[%s934_s4] sm:$0x1] }
  0xf7   : > { %v666_v30 = vpop.eup %665 }
  0xf8   : > { %671 = vrcp.f32 %v377_v29  ;;  %v380_v31 = vadd.f32 1.0, %v666_v30 }
  0xf9   : > { %v668_v32 = vpop.eup %667 }
  0xfa   : > { %v378_v33 = vadd.f32 1.0, %v668_v32  ;;  %673 = vrcp.f32 %v380_v31 }
  0xfc   : > { %675 = vrcp.f32 %v378_v33 }
 0x103   : > { %v670_v36 = vpop.eup %669 }
 0x104   : > { %v391_v41 = vmul.f32 %v670_v36, %v359_v13  ;;  %v440_v13 = vld [vmem:[%s933_s3 + $0x18] sm:$0xff] }
 0x105   : > { %v672_v37 = vpop.eup %671 }
 0x106   : > { %v389_v38 = vmul.f32 %v672_v37, %v351_v17  ;;  %v403_v45 = vsel %vm398_vm2, %v391_v41, 0.0 }
 0x107   : > { %v674_v39 = vpop.eup %673 }
 0x108   : > { %v401_v40 = vsel %vm398_vm2, %v389_v38, 0.0  ;;  %v392_v46 = vmul.f32 %v674_v39, %v362_v20 }
 0x109   : > { %v676_v42 = vpop.eup %675  ;;  %409 = vadd.xlane.f32.xlu0 %v401_v40 }
 0x10a   : > { %v390_v43 = vmul.f32 %v676_v42, %v354_v24  ;;  %v404_v47 = vsel %vm398_vm2, %v392_v46, 0.0 }
 0x10c   : > { %v402_v44 = vsel %vm398_vm2, %v390_v43, 0.0 }
 0x10d   : > { %411 = vadd.xlane.f32.xlu1 %v402_v44  ;;  %413 = vadd.xlane.f32.xlu0 %v403_v45 }
 0x111   : > { %415 = vadd.xlane.f32.xlu0 %v404_v47 }
 0x192   : > { %v410_v49 = vpop.xlane.xlu0 %409 }
 0x193   : > { %v417_v50 = vadd.f32 %v410_v49, %v405_v48 }
 0x195   : > { %422 = vst.msk [vmem:[#allocation2] sm:$0xff] %vm250_vm1, %v417_v50 }
 0x196   : > { %v412_v53 = vpop.xlane.xlu1 %411  ;;  %v414_v54 = vpop.xlane.xlu0 %413 }
 0x197   : > { %v418_v55 = vadd.f32 %v412_v53, %v406_v51  ;;  %v419_v56 = vadd.f32 %v414_v54, %v407_v52 }
 0x199   : > { %423 = vst.msk [vmem:[#allocation2 + $0x8] sm:$0xff] %vm250_vm1, %v418_v55  ;;  %424 = vst.msk [vmem:[#allocation2 + $0x10] sm:$0xff] %vm250_vm1, %v419_v56 }
 0x19a   : > { %v416_v58 = vpop.xlane.xlu0 %415 }
 0x19b   : > { %v420_v59 = vadd.f32 %v416_v58, %v408_v57 }
 0x19c   : > { %v429_v60 = vld [vmem:[#allocation2] sm:$0xff] }
 0x19d   : > { %425 = vst.msk [vmem:[#allocation2 + $0x18] sm:$0xff] %vm250_vm1, %v420_v59  ;;  %v433_v61 = vmul.f32 0.015625, %v429_v60 }
 0x19f   : > { %443 = vperm.xlu1 %656, %v433_v61  }
 0x1a0   : > { %v430_v62 = vld [vmem:[#allocation2 + $0x8] sm:$0xff]  ;;  %v431_v63 = vld [vmem:[#allocation2 + $0x10] sm:$0xff] }
 0x1a1   : > { %v434_v0 = vmul.f32 0.015625, %v430_v62  ;;  %v435_v1 = vmul.f32 0.015625, %v431_v63 }
 0x1a3   : > { %448 = vperm.xlu0 %655, %v434_v0   ;;  %453 = vperm.xlu1 %656, %v435_v1  }
 0x1a4   : > { %v432_v2 = vld [vmem:[#allocation2 + $0x18] sm:$0xff] }
 0x1a5   : > { %v436_v3 = vmul.f32 0.015625, %v432_v2 }
 0x1a7   : > { %458 = vperm.xlu1 %656, %v436_v3  }
 0x21a   : > { %v444_v5 = vpop.permute.xlu1 %443 }
 0x21b   : > { %v461_v8 = vmul.f32 %v444_v5, %v437_v4 }
 0x21d   : > { %v466_v14 = vsel %vm465_vm3, %v461_v8, 0.0 }
 0x21e   : > { %v454_v9 = vpop.permute.xlu1 %453  ;;  %v449_v10 = vpop.permute.xlu0 %448 }
 0x21f   : > { %v463_v11 = vmul.f32 %v454_v9, %v439_v6  ;;  %v462_v12 = vmul.f32 %v449_v10, %v438_v7 }
 0x221   : > { %v467_v15 = vsel %vm465_vm3, %v462_v12, 0.0  ;;  %v469_v18 = vsel %vm465_vm3, %v463_v11, 0.0 }
 0x222   : > { %v468_v16 = vadd.f32 %v467_v15, %v466_v14  ;;  %v459_v17 = vpop.permute.xlu1 %458 }
 0x223   : > { %v464_v19 = vmul.f32 %v459_v17, %v440_v13 }
 0x224   : > { %v470_v20 = vadd.f32 %v469_v18, %v468_v16 }
 0x225   : > { %v471_v21 = vsel %vm465_vm3, %v464_v19, 0.0 }
 0x226   : > { %v472_v22 = vadd.f32 %v471_v21, %v470_v20 }
 0x228   : > { %v473_v23 = vrot.slane %v472_v22, 4 }
 0x22a   : > { %v474_v24 = vadd.f32 %v473_v23, %v472_v22 }
 0x22c   : > { %v475_v25 = vrot.slane %v474_v24, 2 }
 0x22e   : > { %v476_v26 = vadd.f32 %v475_v25, %v474_v24 }
 0x230   : > { %v477_v27 = vrot.slane %v476_v26, 1 }
 0x232   : > { %v478_v29 = vadd.f32 %v477_v27, %v476_v26 }
 0x234   : > { %v480_v30 = vadd.f32 %v479_v28, %v478_v29 }
 0x236   : > { %482 = vst.msk [vmem:[%s236_s29] sm:$0x1] %vm481_vm4, %v480_v30 }
 0x237   : > { %690 = shalt.err (!%p687_p5)
}
 0x238   : > { %s691_s15 = scalar_lea.hbm %s494_s10, 16  ;;  %s695_s24 = scalar_lea.hbm %s935_s5, 32 }
 0x239   : > { %p692_p6 = scmp.ne.s32.totalorder %s494_s10, %s691_s15  ;;  %p696_p10 = scmp.lt.s32.totalorder %s494_s10, %s935_s5 }
 0x23a   : > { %p697_p11 = scmp.lt.s32.totalorder %s695_s24, %s691_s15 }
 0x23b   : > { %p693_p7 = pnand %p692_p6, %p828_p4 }
 0x23c   : > { %p698_p12 = por %p697_p11, %p696_p10 }
 0x23d   : > { %p694_p9 = pneg %p693_p7 }
 0x23f   : > { %p699_p13 = pnand %p698_p12, %p694_p9 }
 0x241   : > { %702 = shalt.err (!%p699_p13)
}
 0x242   : > { %598 = dma.vmem_to_hbm [thread:$0]  (%p828_p4), %s497_s7, 16, %s494_s10, %s484_s11  }
 0x243 PF: > { %p604_p0 = scmp.ge.s32.totalorder %s753_s23, 2  ;;  %s508_s29 = sand.u32 1, %s733_s18  }
 0x244   : > { %s509_s8 = scalar_lea.sflag [#allocation4], %s508_s29 }
 0x245   : > { %p601_p1 = pnand %p604_p0, %p835_p8 }
 0x247   : > { %p602_p2 = pneg %p601_p1 }
 0x249   : > { %728 = dma.done.wait (%p602_p2), %s509_s8, 16  }
 0x24a   : > { %730 = vsyncadd (%p602_p2), %s509_s8, 4294967280  ;;  %s18_s23 = sadd.s32 1, %s753_s23   ;;  %s938_s18 = smov %s737_s19 }
 0x24b   : > { %p15_p3 = scmp.ge.s32.totalorder %s18_s23, 4   ;;  %s939_s19 = smov %s741_s20 }
 0x24c   : > { %s940_s20 = smov %s841_s6  ;;  %s941_s21 = smov %s749_s22 }
 0x24d   : > { %s942_s22 = smov %s944_s26  ;;  %17 = sbr.rel (!%p15_p3) target bundleno = 4 (0x4), region = 83 }
 0x252   :  { %513 = vsyncpa [#allocation4], 1 }
 0x253   :  { %515 = vsyncpa [#allocation4 + $0x1], 1 }

</bundles_post_ra>
